<compile_context>
chip_gen: v7x
topology: tpu7x:2x2x1
jax: 0.10.0
libtpu: 0.0.40
codegen_flags: <defaults>
</compile_context>

<pallas_src>
import functools

import jax
import jax.numpy as jnp
from jax import lax
from jax.experimental import pallas as pl
from jax.experimental.pallas import tpu as pltpu


def _vmem_limit_bytes():
    # Per-generation budget: ~half of physical VMEM (v5e/v6e: 128 MiB,
    # v7x: 64 MiB). Conservative fallback if the query is unavailable
    # (e.g. interpret mode on CPU).
    try:
        return int(pltpu.get_tpu_info().vmem_capacity_bytes // 2)
    except Exception:
        return 32 * 1024 * 1024


_VMEM_LIMIT = _vmem_limit_bytes()


def _pick_row_tile(h, bytes_per_row):
    """Largest row tile (full H, or a multiple-of-8 divisor of H) whose working
    set fits in ~75% of the per-generation VMEM budget."""
    budget = max(int(_VMEM_LIMIT * 0.75), 1)
    max_rows = max(8, budget // max(int(bytes_per_row), 1))
    if h <= max_rows:
        return h
    t = min(max_rows, h)
    t -= t % 8
    while t >= 8:
        if h % t == 0:
            return t
        t -= 8
    return h  # TODO(synk): no multiple-of-8 divisor fits the budget; full plane.


def _plane_min(v):  # (H, W) -> (1, 1), rank-2 throughout (safe lowering)
    return jnp.min(jnp.min(v, axis=1, keepdims=True), axis=0, keepdims=True)


def _plane_max(v):
    return jnp.max(jnp.max(v, axis=1, keepdims=True), axis=0, keepdims=True)


# ----------------------------------------------------------------------------
# Kernel 1: Decomposer hot path, one channel per grid step.
#   convx/convy = 3x3 gradient stencils (boundary='symm'); the kernel flip of
#   true convolution is irrelevant because results are squared.
#   detail = to01(convx^2 + convy^2)   (lam dropped: cancels in to01)
#   base   = max(x - detail, 0)
#   The per-image normalization (x *= 1/max if max>1) is folded in via the
#   scalar-prefetch scale vector.
# ----------------------------------------------------------------------------
def _decompose_kernel(scale_ref, img_ref, base_ref, det_ref):
    c = pl.program_id(0)
    x = img_ref[0] * scale_ref[c]           # (H, W) plane, normalization folded in
    H, W = x.shape

    # Precomputed edge masks (hoisted; built once per plane).
    row = lax.broadcasted_iota(jnp.int32, (H, W), 0)
    col = lax.broadcasted_iota(jnp.int32, (H, W), 1)
    first_col = col == 0
    last_col = col == W - 1
    first_row = row == 0
    last_row = row == H - 1

    # Symmetric ('symm') boundary shifts: XLU roll (non-negative shifts only)
    # + VPU select against the edge masks.  No slice+concat VMEM copies.
    def left(v):    # v[i, j-1]; v[i, 0] at j == 0
        return jnp.where(first_col, v, pltpu.roll(v, 1, axis=1))

    def right(v):   # v[i, j+1]; v[i, W-1] at j == W-1   (roll by W-1 == roll by -1)
        return jnp.where(last_col, v, pltpu.roll(v, W - 1, axis=1))

    def up(v):      # v[i-1, j]; v[0, j] at i == 0
        return jnp.where(first_row, v, pltpu.roll(v, 1, axis=0))

    def down(v):    # v[i+1, j]; v[H-1, j] at i == H-1   (roll by H-1 == roll by -1)
        return jnp.where(last_row, v, pltpu.roll(v, H - 1, axis=0))

    # Separable 3x3 gradient stencils (signs irrelevant: results are squared).
    vsum = up(x) + x + down(x)              # gx = [1,1,1]^T (x) [1,0,-1]
    convx = left(vsum) - right(vsum)
    hsum = left(x) + x + right(x)           # gy = [1,0,-1]^T (x) [1,1,1]
    convy = up(hsum) - down(hsum)

    conv = convx * convx + convy * convy
    # to01 (faithful: shift by |min|, then scale by 1/max of the shifted plane).
    conv = conv + jnp.abs(_plane_min(conv))
    mx = jnp.maximum(_plane_max(conv), 1e-30)   # guard all-zero planes (ref would NaN)
    conv = conv * (1.0 / mx)                    # scalar divide once per plane
    det_ref[0] = conv
    base_ref[0] = jnp.maximum(x - conv, 0.0)


def decompose_planes(planes_chw, scales):
    """Decomposer() on a stack of planes; per-plane scales folded in."""
    C, H, W = planes_chw.shape
    spec = pl.BlockSpec((1, H, W), lambda c, scale: (c, 0, 0))
    base, detail = pl.pallas_call(
        _decompose_kernel,
        out_shape=(jax.ShapeDtypeStruct((C, H, W), jnp.float32),
                   jax.ShapeDtypeStruct((C, H, W), jnp.float32)),
        grid_spec=pltpu.PrefetchScalarGridSpec(
            num_scalar_prefetch=1,
            grid=(C,),
            in_specs=[spec],
            out_specs=(spec, spec)),
        compiler_params=pltpu.CompilerParams(
            dimension_semantics=("parallel",),
            vmem_limit_bytes=_VMEM_LIMIT),
    )(scales, planes_chw)
    return base, detail


# ----------------------------------------------------------------------------
# Kernel 2: fused add_channel(base) + add_channel(detail) + fuse_base.
#   In the reference, np.maximum(c0, c1, c2) uses c2 as the *out* argument, so
#   base_cloud channel 2 is overwritten with max(c0, c1) -- the to01 produced
#   by add_channel for that channel is dead and not computed.  detail_cloud's
#   add_channel keeps its live to01 on channel 2; its global min/max are
#   precomputed in XLA and passed as SMEM scalars so the spatial axis can be
#   row-tiled and pipelined ("parallel" grid).
# ----------------------------------------------------------------------------
def _channel_fuse_kernel(d2stat_ref, bc_ref, bi_ref, dc_ref,
                         fused_ref, bc3_ref, dc3_ref, *, a1, a2):
    # --- base path: add_channel-lite + fuse_base -----------------------------
    bc0 = bc_ref[0]                                 # (TH, W)
    bc1 = bc_ref[1]
    m = jnp.maximum(bc0, bc1)
    fused_ref[...] = a1 * m[None] + a2 * bi_ref[...]   # broadcast over 3 channels
    bc3_ref[0] = bc0
    bc3_ref[1] = bc1
    bc3_ref[2] = m
    # --- detail path: add_channel with live to01 on channel 2 ---------------
    dc0 = dc_ref[0]
    dc1 = dc_ref[1]
    d2 = jnp.maximum(dc0, dc1)
    d2 = (d2 + d2stat_ref[0]) * d2stat_ref[1]       # to01 with precomputed stats
    dc3_ref[0] = dc0
    dc3_ref[1] = dc1
    dc3_ref[2] = d2


def channel_fuse(base_cloud, base_img, detail_cloud, alpha1=0.5, alpha2=0.5):
    _, H, W = base_cloud.shape
    # Global to01 stats of max(dc0, dc1), computed once in XLA (cheap reduce).
    d2 = jnp.maximum(detail_cloud[0], detail_cloud[1])
    shift = jnp.abs(jnp.min(d2))
    scale = 1.0 / jnp.maximum(jnp.max(d2) + shift, 1e-30)
    d2_stats = jnp.stack([shift, scale]).astype(jnp.float32)

    # 7 input planes + 9 output planes of f32, double-buffered.
    th = _pick_row_tile(H, bytes_per_row=2 * (7 + 9) * 4 * W)
    spec2 = pl.BlockSpec((2, th, W), lambda i, s: (0, i, 0))
    spec3 = pl.BlockSpec((3, th, W), lambda i, s: (0, i, 0))
    out3 = jax.ShapeDtypeStruct((3, H, W), jnp.float32)
    fused, bc3, dc3 = pl.pallas_call(
        functools.partial(_channel_fuse_kernel, a1=alpha1, a2=alpha2),
        out_shape=(out3, out3, out3),
        grid_spec=pltpu.PrefetchScalarGridSpec(
            num_scalar_prefetch=1,
            grid=(H // th,),
            in_specs=[spec2, spec3, spec2],
            out_specs=(spec3, spec3, spec3)),
        compiler_params=pltpu.CompilerParams(
            dimension_semantics=("parallel",),
            vmem_limit_bytes=_VMEM_LIMIT),
    )(d2_stats, base_cloud, base_img, detail_cloud)
    return fused, bc3, dc3


# ----------------------------------------------------------------------------
# Kernel 3: DetailFusion.multi_layer_fusion hot path.
#   Grid = (row_tiles [parallel], layers [arbitrary]).  Per layer and tile:
#   Ci = ||feat||_1 over channels (leading-axis plane adds, f32 accumulate),
#   2-way softmax computed as a numerically-stable sigmoid (one EUP exp +
#   approx reciprocal), fused = w1*detail_img + w2*detail_cloud, running max
#   across layers into the per-tile resident output.  The final global to01
#   is a tiny XLA epilogue (it needs the whole-plane min/max).
# ----------------------------------------------------------------------------
def _detail_fusion_kernel(f1_ref, f2_ref, di_ref, dc_ref, out_ref):
    l = pl.program_id(1)
    # Keep the widen-then-abs f32 path for v5e portability (no bf16 VALU there).
    f1 = f1_ref[0].astype(jnp.float32)                  # (C, TH, W)
    f2 = f2_ref[0].astype(jnp.float32)
    c1 = jnp.sum(jnp.abs(f1), axis=0)                   # (TH, W): plane adds (VPU)
    c2 = jnp.sum(jnp.abs(f2), axis=0)
    # softmax([c1, c2])[0] == sigmoid(c1 - c2), computed stably (no exp overflow).
    d = c1 - c2
    z = jnp.exp(-jnp.abs(d))
    r = pl.reciprocal(1.0 + z, approx=True)
    w1 = jnp.where(d >= 0.0, r, z * r)
    w2 = 1.0 - w1
    fused_layer = w1[None] * di_ref[...] + w2[None] * dc_ref[...]   # (3, TH, W)

    @pl.when(l == 0)
    def _():
        out_ref[...] = fused_layer

    @pl.when(l > 0)
    def _():
        out_ref[...] = jnp.maximum(out_ref[...], fused_layer)


def synthetic_encoder_batched(x_nchw, weights):
    # TODO(synk): pretrained MobileNetV3-Large feature extractor (torchvision)
    # cannot be reproduced in-script; replaced by a small deterministic conv
    # encoder.  Both inputs are batched (N=2) through a single conv chain (the
    # only MXU work in the pipeline).  Features keep full resolution, so the
    # reference Upsample and block_mean(block_size=1) are identities.  Emitted
    # in bf16 to halve HBM traffic into the fusion kernel.
    feats = []
    x = x_nchw                                           # (2, 3, H, W)
    for w in weights:
        x = lax.conv_general_dilated(x, w, window_strides=(1, 1), padding="SAME",
                                     dimension_numbers=("NCHW", "OIHW", "NCHW"))
        x = jax.nn.relu(x)
        feats.append(x)
    return jnp.stack(feats).astype(jnp.bfloat16)         # (L, 2, C, H, W)


def detail_fusion(det_img_chw, det_cloud_chw, encoder_weights):
    x = jnp.stack([det_img_chw, det_cloud_chw], axis=0)   # (2, 3, H, W)
    feats = synthetic_encoder_batched(x, encoder_weights)  # (L, 2, C, H, W) bf16
    f1 = feats[:, 0]                                       # (L, C, H, W)
    f2 = feats[:, 1]
    L, C, H, W = f1.shape

    # Per-row working set: 2 bf16 feature blocks (C planes) + 2 input planes(3)
    # (double-buffered) + resident 3-plane f32 output.
    bytes_per_row = 2 * (2 * C * 2 + 2 * 3 * 4) * W + 3 * 4 * W
    th = _pick_row_tile(H, bytes_per_row=bytes_per_row)

    feat_spec = pl.BlockSpec((1, C, th, W), lambda qi, l: (l, 0, qi, 0))
    plane_spec = pl.BlockSpec((3, th, W), lambda qi, l: (0, qi, 0))
    out = pl.pallas_call(
        _detail_fusion_kernel,
        out_shape=jax.ShapeDtypeStruct((3, H, W), jnp.float32),
        grid=(H // th, L),
        in_specs=[feat_spec, feat_spec, plane_spec, plane_spec],
        out_specs=plane_spec,
        compiler_params=pltpu.CompilerParams(
            dimension_semantics=("parallel", "arbitrary"),
            vmem_limit_bytes=_VMEM_LIMIT),
    )(f1, f2, det_img_chw, det_cloud_chw)
    # Final global to01 (needs whole-plane min/max) as a tiny XLA epilogue.
    out = out + jnp.abs(jnp.min(out))
    out = out * (1.0 / jnp.maximum(jnp.max(out), 1e-30))
    return out


# ----------------------------------------------------------------------------
# Glue: front-view projection (data-dependent scatter, stays in plain JAX).
# ----------------------------------------------------------------------------
def make_front_proj(cloud, width, height, intrinsic, extrinsic):
    # TODO(synk): make_front_proj source is not provided; this is a standard
    # pinhole projection + scatter of (range, intensity) and per-point colors.
    n = cloud.shape[0]
    xyz1 = jnp.concatenate([cloud[:, :3], jnp.ones((n, 1), jnp.float32)], axis=1)
    cam = xyz1 @ extrinsic.T
    proj = cam[:, :3] @ intrinsic.T
    z = proj[:, 2]
    u = jnp.floor(proj[:, 0] / z).astype(jnp.int32)
    v = jnp.floor(proj[:, 1] / z).astype(jnp.int32)
    valid = (z > 1e-3) & (u >= 0) & (u < width) & (v >= 0) & (v < height)
    u = jnp.where(valid, u, width)         # out-of-range indices -> dropped
    v = jnp.where(valid, v, height)
    depth = jnp.linalg.norm(cloud[:, :3], axis=1)
    intensity = cloud[:, 3]
    front = jnp.zeros((height, width, 2), jnp.float32)
    front = front.at[v, u, 0].set(depth, mode="drop")
    front = front.at[v, u, 1].set(intensity, mode="drop")
    point_colors = jnp.stack([intensity + 0.5, depth, jnp.ones_like(depth)], axis=1)
    colors = jnp.zeros((height, width, 3), jnp.float32)
    colors = colors.at[v, u, :].set(point_colors, mode="drop")
    return front, colors


class FrontImageFusion:
    """JAX/Pallas port of utils.fusion.FrontImageFusion forward pass."""

    def __init__(self, params, encoder_weights):
        self.width = params["width"]
        self.height = params["height"]
        self.intrinsic = params["intrinsic"]
        self.extrinsic = params["extrinsic"]
        self.encoder_weights = encoder_weights

    def __call__(self, cloud, image_):
        front, colors = make_front_proj(cloud, self.width, self.height,
                                        self.intrinsic, self.extrinsic)
        # image[argwhere(colors == 0)] = 0  ==  where(colors == 0, 0, image)
        image = jnp.where(colors == 0.0, 0.0, image_).astype(jnp.float32)

        # Both Decomposer() invocations share one pallas_call: stack the planes
        # into a (5, H, W) tensor.  The per-image `*= 1/max if max>1`
        # normalization is folded into kernel 1 via per-plane scale scalars.
        front_chw = jnp.transpose(front, (2, 0, 1)).astype(jnp.float32)
        image_chw = jnp.transpose(image, (2, 0, 1))
        planes = jnp.concatenate([front_chw, image_chw], axis=0)
        mx_f = jnp.max(front)
        mx_i = jnp.max(image)
        s_f = jnp.where(mx_f > 1.0, 1.0 / mx_f, 1.0)
        s_i = jnp.where(mx_i > 1.0, 1.0 / mx_i, 1.0)
        scales = jnp.stack([s_f, s_f, s_i, s_i, s_i]).astype(jnp.float32)

        base, detail = decompose_planes(planes, scales)     # (5, H, W) each
        base_cloud, base_img = base[:2], base[2:]
        detail_cloud, detail_img = detail[:2], detail[2:]

        # add_channel(base) + add_channel(detail) + fuse_base, one launch.
        fused_base, base_cloud3, detail_cloud3 = channel_fuse(
            base_cloud, base_img, detail_cloud)

        fused_detail = detail_fusion(detail_img, detail_cloud3,
                                     self.encoder_weights)

        hwc = lambda x: jnp.transpose(x, (1, 2, 0))
        return {
            "front": front,
            "image": image,
            "base_image": hwc(base_img),
            "detail_image": hwc(detail_img),
            "base_cloud": hwc(base_cloud3),
            "detail_cloud": hwc(detail_cloud3),
            "fused_base": hwc(fused_base),
            "fused_detail": hwc(fused_detail),
        }


if __name__ == "__main__":
    H, W = 64, 128      # params['height'], params['width'] (W multiple of 128)
    N = 400             # number of lidar points
    C_FEAT = 8          # synthetic encoder channels
    key = jax.random.PRNGKey(0)
    k_xy, k_z, k_i, k_img, k_w1, k_w2 = jax.random.split(key, 6)

    xy = jax.random.uniform(k_xy, (N, 2), minval=-1.0, maxval=1.0)
    z = jax.random.uniform(k_z, (N, 1), minval=2.0, maxval=6.0)
    intensity = jax.random.uniform(k_i, (N, 1))
    cloud = jnp.concatenate([xy, z, intensity], axis=1).astype(jnp.float32)

    image = jax.random.uniform(k_img, (H, W, 3), dtype=jnp.float32)

    intrinsic = jnp.array([[40.0, 0.0, W / 2.0],
                           [0.0, 40.0, H / 2.0],
                           [0.0, 0.0, 1.0]], dtype=jnp.float32)
    extrinsic = jnp.eye(4, dtype=jnp.float32)

    # Deterministic synthetic encoder weights (stand-in for MobileNetV3).
    encoder_weights = [
        0.1 * jax.random.normal(k_w1, (C_FEAT, 3, 3, 3), jnp.float32),
        0.1 * jax.random.normal(k_w2, (C_FEAT, C_FEAT, 3, 3), jnp.float32),
    ]

    params = {"width": W, "height": H,
              "intrinsic": intrinsic, "extrinsic": extrinsic}
    model = FrontImageFusion(params, encoder_weights)
    out = model(cloud, image)
    jax.block_until_ready(out)
    print("KERNEL_OK")
</pallas_src>

<mosaic_0001>
module attributes {stable_mosaic.version = 11 : i64} {
  func.func @_decompose_kernel(%arg0: i32, %arg1: memref<5xf32, #tpu.memory_space<smem>>, %arg2: memref<1x64x128xf32, #tpu.memory_space<vmem>>, %arg3: memref<1x64x128xf32, #tpu.memory_space<vmem>>, %arg4: memref<1x64x128xf32, #tpu.memory_space<vmem>>) attributes {dimension_semantics = [#tpu.dimension_semantics<parallel>], iteration_bounds = array<i64: 5>, scalar_prefetch = 1 : i64, scratch_operands = 0 : i64, tpu.core_type = #tpu.core_type<tc>, window_params = [{transform_indices = @transform_0, window_bounds = array<i64: 1, 64, 128>}, {transform_indices = @transform_1, window_bounds = array<i64: 1, 64, 128>}, {transform_indices = @transform_2, window_bounds = array<i64: 1, 64, 128>}]} {
    %c0 = arith.constant 0 : index
    %c0_0 = arith.constant 0 : index
    %c0_1 = arith.constant 0 : index
    %0 = vector.load %arg2[%c0, %c0_0, %c0_1] : memref<1x64x128xf32, #tpu.memory_space<vmem>>, vector<1x64x128xf32>
    %1 = vector.shape_cast %0 : vector<1x64x128xf32> to vector<64x128xf32>
    %2 = arith.index_cast %arg0 : i32 to index
    %3 = memref.load %arg1[%2] : memref<5xf32, #tpu.memory_space<smem>>
    %4 = vector.broadcast %3 : f32 to vector<64x128xf32>
    %5 = arith.mulf %1, %4 : vector<64x128xf32>
    %6 = tpu.iota {dimensions = array<i32: 0>} : vector<64x128xi32>
    %7 = tpu.iota {dimensions = array<i32: 1>} : vector<64x128xi32>
    %c0_i32 = arith.constant 0 : i32
    %8 = vector.broadcast %c0_i32 : i32 to vector<64x128xi32>
    %9 = arith.cmpi eq, %7, %8 : vector<64x128xi32>
    %c127_i32 = arith.constant 127 : i32
    %10 = vector.broadcast %c127_i32 : i32 to vector<64x128xi32>
    %11 = arith.cmpi eq, %7, %10 : vector<64x128xi32>
    %c0_i32_2 = arith.constant 0 : i32
    %12 = vector.broadcast %c0_i32_2 : i32 to vector<64x128xi32>
    %13 = arith.cmpi eq, %6, %12 : vector<64x128xi32>
    %c63_i32 = arith.constant 63 : i32
    %14 = vector.broadcast %c63_i32 : i32 to vector<64x128xi32>
    %15 = arith.cmpi eq, %6, %14 : vector<64x128xi32>
    %c1_i32 = arith.constant 1 : i32
    %16 = tpu.dynamic_rotate %5 by %c1_i32 dim 0 : vector<64x128xf32>, i32 -> vector<64x128xf32>
    %17 = arith.select %13, %5, %16 : vector<64x128xi1>, vector<64x128xf32>
    %18 = arith.addf %17, %5 : vector<64x128xf32>
    %c63_i32_3 = arith.constant 63 : i32
    %19 = tpu.dynamic_rotate %5 by %c63_i32_3 dim 0 : vector<64x128xf32>, i32 -> vector<64x128xf32>
    %20 = arith.select %15, %5, %19 : vector<64x128xi1>, vector<64x128xf32>
    %21 = arith.addf %18, %20 : vector<64x128xf32>
    %c1_i32_4 = arith.constant 1 : i32
    %22 = tpu.dynamic_rotate %21 by %c1_i32_4 dim 1 : vector<64x128xf32>, i32 -> vector<64x128xf32>
    %23 = arith.select %9, %21, %22 : vector<64x128xi1>, vector<64x128xf32>
    %c127_i32_5 = arith.constant 127 : i32
    %24 = tpu.dynamic_rotate %21 by %c127_i32_5 dim 1 : vector<64x128xf32>, i32 -> vector<64x128xf32>
    %25 = arith.select %11, %21, %24 : vector<64x128xi1>, vector<64x128xf32>
    %26 = arith.subf %23, %25 : vector<64x128xf32>
    %c1_i32_6 = arith.constant 1 : i32
    %27 = tpu.dynamic_rotate %5 by %c1_i32_6 dim 1 : vector<64x128xf32>, i32 -> vector<64x128xf32>
    %28 = arith.select %9, %5, %27 : vector<64x128xi1>, vector<64x128xf32>
    %29 = arith.addf %28, %5 : vector<64x128xf32>
    %c127_i32_7 = arith.constant 127 : i32
    %30 = tpu.dynamic_rotate %5 by %c127_i32_7 dim 1 : vector<64x128xf32>, i32 -> vector<64x128xf32>
    %31 = arith.select %11, %5, %30 : vector<64x128xi1>, vector<64x128xf32>
    %32 = arith.addf %29, %31 : vector<64x128xf32>
    %c1_i32_8 = arith.constant 1 : i32
    %33 = tpu.dynamic_rotate %32 by %c1_i32_8 dim 0 : vector<64x128xf32>, i32 -> vector<64x128xf32>
    %34 = arith.select %13, %32, %33 : vector<64x128xi1>, vector<64x128xf32>
    %c63_i32_9 = arith.constant 63 : i32
    %35 = tpu.dynamic_rotate %32 by %c63_i32_9 dim 0 : vector<64x128xf32>, i32 -> vector<64x128xf32>
    %36 = arith.select %15, %32, %35 : vector<64x128xi1>, vector<64x128xf32>
    %37 = arith.subf %34, %36 : vector<64x128xf32>
    %38 = arith.mulf %26, %26 : vector<64x128xf32>
    %39 = arith.mulf %37, %37 : vector<64x128xf32>
    %40 = arith.addf %38, %39 : vector<64x128xf32>
    %cst = arith.constant dense<0x7F800000> : vector<64xf32>
    %41 = vector.multi_reduction <minimumf>, %40, %cst [1] : vector<64x128xf32> to vector<64xf32>
    %42 = vector.shape_cast %41 : vector<64xf32> to vector<64x1xf32>
    %cst_10 = arith.constant dense<0x7F800000> : vector<1xf32>
    %43 = vector.multi_reduction <minimumf>, %42, %cst_10 [0] : vector<64x1xf32> to vector<1xf32>
    %44 = vector.shape_cast %43 : vector<1xf32> to vector<1x1xf32>
    %45 = math.absf %44 : vector<1x1xf32>
    %46 = vector.broadcast %45 : vector<1x1xf32> to vector<64x128xf32>
    %47 = arith.addf %40, %46 : vector<64x128xf32>
    %cst_11 = arith.constant dense<0xFF800000> : vector<64xf32>
    %48 = vector.multi_reduction <maximumf>, %47, %cst_11 [1] : vector<64x128xf32> to vector<64xf32>
    %49 = vector.shape_cast %48 : vector<64xf32> to vector<64x1xf32>
    %cst_12 = arith.constant dense<0xFF800000> : vector<1xf32>
    %50 = vector.multi_reduction <maximumf>, %49, %cst_12 [0] : vector<64x1xf32> to vector<1xf32>
    %51 = vector.shape_cast %50 : vector<1xf32> to vector<1x1xf32>
    %cst_13 = arith.constant 1.000000e-30 : f32
    %52 = vector.broadcast %cst_13 : f32 to vector<1x1xf32>
    %53 = arith.maximumf %51, %52 : vector<1x1xf32>
    %cst_14 = arith.constant 1.000000e+00 : f32
    %54 = vector.broadcast %cst_14 : f32 to vector<1x1xf32>
    %55 = arith.divf %54, %53 : vector<1x1xf32>
    %56 = vector.broadcast %55 : vector<1x1xf32> to vector<64x128xf32>
    %57 = arith.mulf %47, %56 : vector<64x128xf32>
    %c0_15 = arith.constant 0 : index
    %c0_16 = arith.constant 0 : index
    %c0_17 = arith.constant 0 : index
    %58 = vector.load %arg4[%c0_15, %c0_16, %c0_17] : memref<1x64x128xf32, #tpu.memory_space<vmem>>, vector<1x64x128xf32>
    %59 = vector.shape_cast %58 : vector<1x64x128xf32> to vector<64x128xf32>
    %60 = vector.shape_cast %57 : vector<64x128xf32> to vector<1x64x128xf32>
    tpu.vector_store %arg4[%c0_15, %c0_16, %c0_17], %60 {strides = array<i32>} : memref<1x64x128xf32, #tpu.memory_space<vmem>>, vector<1x64x128xf32>,
    %61 = arith.subf %5, %57 : vector<64x128xf32>
    %cst_18 = arith.constant 0.000000e+00 : f32
    %62 = vector.broadcast %cst_18 : f32 to vector<64x128xf32>
    %63 = arith.maximumf %61, %62 : vector<64x128xf32>
    %c0_19 = arith.constant 0 : index
    %c0_20 = arith.constant 0 : index
    %c0_21 = arith.constant 0 : index
    %64 = vector.load %arg3[%c0_19, %c0_20, %c0_21] : memref<1x64x128xf32, #tpu.memory_space<vmem>>, vector<1x64x128xf32>
    %65 = vector.shape_cast %64 : vector<1x64x128xf32> to vector<64x128xf32>
    %66 = vector.shape_cast %63 : vector<64x128xf32> to vector<1x64x128xf32>
    tpu.vector_store %arg3[%c0_19, %c0_20, %c0_21], %66 {strides = array<i32>} : memref<1x64x128xf32, #tpu.memory_space<vmem>>, vector<1x64x128xf32>,
    return
  }
  func.func @transform_0(%arg0: i32, %arg1: memref<5xf32, #tpu.memory_space<smem>>) -> (i32, i32, i32) {
    %c0_i32 = arith.constant 0 : i32
    %c0_i32_0 = arith.constant 0 : i32
    %c0_i32_1 = arith.constant 0 : i32
    return %arg0, %c0_i32, %c0_i32_0 : i32, i32, i32
  }
  func.func @transform_1(%arg0: i32, %arg1: memref<5xf32, #tpu.memory_space<smem>>) -> (i32, i32, i32) {
    %c0_i32 = arith.constant 0 : i32
    %c0_i32_0 = arith.constant 0 : i32
    %c0_i32_1 = arith.constant 0 : i32
    return %arg0, %c0_i32, %c0_i32_0 : i32, i32, i32
  }
  func.func @transform_2(%arg0: i32, %arg1: memref<5xf32, #tpu.memory_space<smem>>) -> (i32, i32, i32) {
    %c0_i32 = arith.constant 0 : i32
    %c0_i32_0 = arith.constant 0 : i32
    %c0_i32_1 = arith.constant 0 : i32
    return %arg0, %c0_i32, %c0_i32_0 : i32, i32, i32
  }
}

</mosaic_0001>

<bundles_post_ra>
// kernel: tpu_custom_call.1
= control target key start
LH: loop header
LB: loop body
LE: loop exit
PB: predicated region body
PF: predicated region fallthrough
CT: control target
= control target key end

     0   :  { %s1609_s0 = inlined_call_operand.hbm [shape: f32[5], index: 0, kind: input, shape index: {}]   ;;  %s1610_s1 = inlined_call_operand.hbm [shape: f32[5,64,128], index: 1, kind: input, shape index: {}]   ;;  %s1611_s2 = inlined_call_operand.hbm [shape: f32[5,64,128], index: 2, kind: output, shape index: {0}]   ;;  %s1612_s3 = inlined_call_operand.hbm [shape: f32[5,64,128], index: 3, kind: output, shape index: {1}]  }
   0x1   :  { %s822_s14 = scalar_lea.hbm %s1609_s0, 16 }
   0x2   :  { %p823_p0 = scmp.ne.s32.totalorder %s1609_s0, %s822_s14  ;;  %p826_p1 = scmp.lt.u32.totalorder %s822_s14, %s1609_s0 }
   0x4   :  { %p828_p2 = pnand %p826_p1, %p823_p0 }
   0x6   :  { %831 = shalt.err (!%p828_p2)  }
   0x7   :  { %s964_s19 = smov [#allocation3]  }
   0x8   :  { %10 = dma.hbm_to_smem %s1609_s0, 16, %s964_s19, [#allocation2] }
   0x9   :  { %934 = dma.done.wait [#allocation2], 16 }
   0xa   :  { %935 = vsyncadd [#allocation2], 4294967280 }
   0xb   :  { %12 = sfence }
   0xc   :  { %13 = vsyncpa [#allocation5], 0 }
   0xd   :  { %15 = vsyncpa [#allocation5 + $0x1], 0 }
   0xe   :  { %16 = vsyncpa [#allocation6], 0 }
   0xf   :  { %18 = vsyncpa [#allocation6 + $0x1], 0 }
  0x10   :  { %19 = vsyncpa [#allocation9], 0 }
  0x11   :  { %21 = vsyncpa [#allocation9 + $0x1], 0  ;;  %s1006_s22 = smov 0   ;;  %s1008_s23 = smov 0  }
  0x12   :  { %s1010_s24 = smov 0   ;;  %s1012_s25 = smov 0  }
  0x13 LB: > { %s1027_s0 = sadd.s32 4294967295, %s962_s25   ;;  %s741_s26 = sadd.s32 4294967294, %s962_s25   ;;  %s962_s25 = sphi %s1012_s25, %s1624_s25   ;;  %s958_s24 = sphi %s1010_s24, %s1623_s24   ;;  %s954_s23 = sphi %s1008_s23, %s1622_s23   ;;  %s950_s22 = sphi %s1006_s22, %s1621_s22  }
  0x14   : > { %s1031_s27 = sadd.s32 1, %s962_s25   ;;  %s34_s28 = sadd.s32 1, %s958_s24 }
  0x15   : > { %s31_s29 = ssub.s32 %s962_s25, %s1031_s27  ;;  %p41_p3 = scmp.ne.s32.totalorder %s958_s24, %s954_s23 }
  0x16   : > { %p32_p4 = scmp.eq.s32.totalorder %s31_s29, 0  ;;  %p42_p5 = scmp.eq.s32.totalorder %s962_s25, 0 }
  0x17   : > { %p47_p6 = scmp.ne.s32.totalorder %s954_s23, %s950_s22  ;;  %p48_p7 = scmp.eq.s32.totalorder %s1027_s0, 0 }
  0x18   : > { %s1043_s30 = scalar_select %p32_p4, %s958_s24, %s34_s28  }
  0x19   : > { %p1045_p8 = por %p42_p5, %p41_p3  ;;  %p1049_p9 = por %p48_p7, %p47_p6 }
  0x1a   : > { %p71_p10 = scmp.eq.s32.totalorder %s1027_s0, 4  ;;  %p77_p11 = scmp.eq.s32.totalorder %s741_s26, 4 }
  0x1b   : > { %p779_p12 = scmp.lt.s32.totalorder %s962_s25, 5  ;;  %s123_s8 = sand.u32 1, %s958_s24  }
  0x1c   : > { %p1055_p13 = por %p71_p10, %p41_p3  ;;  %p1059_p0 = por %p77_p11, %p47_p6 }
  0x1d   : > { %s759_s9 = sshll.u32 %s962_s25, 10  ;;  %s744_s10 = sshll.u32 %s123_s8, 6 }
  0x1e   : > { %s1616_s6 = scalar_select %p1055_p13, 1, 0 }
  0x1f   : > { %s1617_s7 = scalar_select %p1059_p0, 1, 0 }
  0x20   : > { %s1068_s13 = scalar_lea.hbm %s1610_s1, %s759_s9  ;;  %s127_s14 = scalar_lea.vmem [#allocation4], %s744_s10 }
  0x21   : > { %s134_s15 = sshll.u32 %s127_s14, 4  ;;  %p1072_p1 = pnand %p779_p12, %p1045_p8  ;;  %s1076_s15 = int_to_ptr.vmem [resolvable:$true] %s134_s15 }
  0x22   : > { %s1078_s17 = scalar_lea.sflag [#allocation5], %s123_s8  ;;  %s832_s18 = scalar_lea.hbm %s1068_s13, 1024 }
  0x23   : > { %p833_p2 = scmp.ne.s32.totalorder %s1068_s13, %s832_s18  ;;  %p834_p3 = pneg %p1072_p1 }
  0x24   : > { %s837_s21 = scalar_lea.hbm %s1610_s1, 5120  ;;  %p838_p6 = scmp.lt.u32.totalorder %s1068_s13, %s1610_s1 }
  0x25   : > { %p835_p4 = pnand %p834_p3, %p833_p2  ;;  %p839_p7 = scmp.lt.u32.totalorder %s837_s21, %s832_s18 }
  0x26   : > { %p841_p10 = scmp.lt.u32.totalorder %s832_s18, %s1068_s13 }
  0x27   : > { %p836_p5 = pneg %p835_p4  ;;  %p840_p8 = por %p839_p7, %p838_p6 }
  0x29   : > { %p842_p11 = por %p841_p10, %p840_p8 }
  0x2b   : > { %p843_p12 = pnand %p842_p11, %p836_p5 }
  0x2d   : > { %846 = shalt.err (!%p843_p12)
}
  0x2e   : > { %s847_s29 = scalar_lea.vmem %s1076_s15, 1024  ;;  %s965_s4 = smov [#allocation4]  }
  0x2f   : > { %p848_p2 = scmp.ne.s32.totalorder %s1076_s15, %s847_s29  ;;  %s852_s8 = sshll.u32 %s965_s4, 4  ;;  %s853_s8 = int_to_ptr.vmem [resolvable:$false] %s852_s8 }
  0x30   : > { %s854_s9 = scalar_lea.vmem %s853_s8, 2048  ;;  %p855_p13 = scmp.lt.s32.totalorder %s1076_s15, %s853_s8 }
  0x31   : > { %p850_p4 = pnand %p848_p2, %p834_p3  ;;  %p856_p6 = scmp.lt.s32.totalorder %s854_s9, %s847_s29 }
  0x33   : > { %p851_p0 = pneg %p850_p4  ;;  %p857_p7 = por %p856_p6, %p855_p13 }
  0x35   : > { %p858_p8 = pnand %p857_p7, %p851_p0 }
  0x37   : > { %861 = shalt.err (!%p858_p8)
}
  0x38   : > { %s966_s10 = smov 128   ;;  %s967_s11 = smov 8  }
  0x39   : > { %771 = dma.hbm_to_vmem [thread:$0]  (!%p1072_p1), %s1068_s13, 1024, %s1076_s15, %s1078_s17, %s966_s10, %s966_s10, %s967_s11  }
  0x3a   : > { %p747_p3 = scmp.ge.s32.totalorder %s962_s25, 1  ;;  %p142_p5 = scmp.lt.s32.totalorder %s962_s25, 6 }
  0x3c   : > { %p143_p10 = pnand %p747_p3, %p142_p5 }
  0x3d   : > { %s1109_s12 = sand.u32 (!%p143_p10), 1, %s954_s23  }
  0x3e   : > { %146 = sbr.rel (%p143_p10) target bundleno = 662 (0x296), region = 24  ;;  %s1112_s14 = sshll.u32 (!%p143_p10), %s1109_s12, 6 }
  0x3f   : > { %s149_s18 = scalar_lea.sflag (!%p143_p10), [#allocation5], %s1109_s12  ;;  %s152_s19 = scalar_lea.vmem (!%p143_p10), [#allocation4], %s1112_s14 }
  0x45   : > { %937 = dma.done.wait (%p1049_p9), %s149_s18, 1024  }
  0x46   : > { %939 = vsyncadd (%p1049_p9), %s149_s18, 4294966272  ;;  %s186_s13 = sld [smem:[#allocation3 + %s1027_s0]]  ;;  %v179_v0 = vld [vmem:[%s152_s19 + $0x8] sm:$0xff]  ;;  %v178_v2 = vld [vmem:[%s152_s19] sm:$0xff]  ;;  %s968_s15 = smov 1   ;;  %v196_v15 = vlaneseq }
  0x47   : > { %v180_v3 = vld [vmem:[%s152_s19 + $0x10] sm:$0xff]  ;;  %v185_v6 = vld [vmem:[%s152_s19 + $0x38] sm:$0xff]  ;;  %v182_v9 = vld [vmem:[%s152_s19 + $0x20] sm:$0xff]  ;;  %s969_s5 = smov 127   ;;  %s760_s16 = sshll.u32 %s1027_s0, 10 }
  0x48   : > { %v181_v10 = vld [vmem:[%s152_s19 + $0x18] sm:$0xff]  ;;  %v184_v13 = vld [vmem:[%s152_s19 + $0x30] sm:$0xff]  ;;  %v183_v14 = vld [vmem:[%s152_s19 + $0x28] sm:$0xff]  ;;  %v1150_v18 = vshrl.u32 %v196_v15, 7  ;;  %s177_s17 = scalar_lea.vmem [#allocation8], %s1112_s14  ;;  %s1503_s28 = scalar_lea.hbm %s1612_s3, %s760_s16 }
  0x49   : > { %s636_s20 = sshll.u32 %s177_s17, 4  ;;  %s1512_s29 = scalar_lea.vmem [#allocation7], %s1112_s14  ;;  %s1505_s20 = int_to_ptr.vmem [resolvable:$true] %s636_s20 }
  0x4a   : > { %vm233_vm0 = vcmp.lt.s32.totalorder %v1150_v18, 1  ;;  %vm209_vm1 = vcmp.eq.s32.totalorder %v1150_v18, 0  ;;  %vm266_vm2 = vcmp.lt.s32.totalorder %v1150_v18, 7  ;;  %v1223_v52 = vadd.s32 56, %v1150_v18  ;;  %s620_s4 = sshll.u32 %s1512_s29, 4  ;;  %s607_s8 = scalar_lea.sflag [#allocation9], %s1109_s12  ;;  %s1555_s4 = int_to_ptr.vmem [resolvable:$true] %s620_s4 }
  0x4b   : > { %s862_s9 = scalar_lea.vmem %s1505_s20, 1024  ;;  %p1619_p13 = scmp.ne.s32.totalorder %s1616_s6, 0 }
  0x4c   : > { %v187_v1 = vstv %s186_s13  ;;  %vm224_vm3 = vcmp.eq.s32.totalorder %v1223_v52, 63  ;;  %p863_p9 = scmp.ne.s32.totalorder %s1505_s20, %s862_s9  ;;  %s970_s10 = smov [#allocation8]  }
  0x4d   : > { %v1121_v4 = vmul.f32 %v187_v1, %v179_v0  ;;  %v1123_v5 = vmul.f32 %v187_v1, %v178_v2  ;;  %v1129_v7 = vmul.f32 %v187_v1, %v180_v3  ;;  %v1131_v8 = vmul.f32 %v187_v1, %v185_v6  ;;  %s866_s11 = sshll.u32 %s970_s10, 4  ;;  %s867_s11 = int_to_ptr.vmem [resolvable:$false] %s866_s11 }
  0x4e   : > { %v1137_v11 = vmul.f32 %v187_v1, %v182_v9  ;;  %v1139_v12 = vmul.f32 %v187_v1, %v181_v10  ;;  %v1145_v16 = vmul.f32 %v187_v1, %v184_v13  ;;  %v1147_v17 = vmul.f32 %v187_v1, %v183_v14  ;;  %p864_p0 = pnand %p863_p9, %p1619_p13  ;;  %s868_s14 = scalar_lea.vmem %s867_s11, 2048 }
  0x4f   : > { %349 = vrot.lane.b32.xlu1 %v1121_v4, %s968_s15  ;;  %347 = vrot.lane.b32.xlu0 %v1123_v5, %s968_s15  ;;  %v225_v19 = vrot.slane %v1123_v5, 7  ;;  %v232_v20 = vrot.slane %v1131_v8, 7  ;;  %v226_v21 = vrot.slane %v1121_v4, 7  ;;  %v259_v23 = vrot.slane %v1121_v4, 1  ;;  %p869_p11 = scmp.lt.s32.totalorder %s1505_s20, %s867_s11  ;;  %p870_p12 = scmp.lt.s32.totalorder %s868_s14, %s862_s9 }
  0x50   : > { %v260_v25 = vrot.slane %v1129_v7, 1  ;;  %v227_v26 = vrot.slane %v1129_v7, 7  ;;  %v258_v28 = vrot.slane %v1123_v5, 1  ;;  %v228_v29 = vrot.slane %v1139_v12, 7  ;;  %p865_p1 = pneg %p864_p0 }
  0x51   : > { %v241_v22 = vsel %vm233_vm0, %v232_v20, %v225_v19  ;;  %v240_v24 = vsel %vm233_vm0, %v225_v19, %v226_v21  ;;  %v261_v31 = vrot.slane %v1139_v12, 1  ;;  %v229_v35 = vrot.slane %v1137_v11, 7  ;;  %p871_p2 = por %p870_p12, %p869_p11 }
  0x52   : > { %v242_v27 = vsel %vm209_vm1, %v1123_v5, %v241_v22  ;;  %v251_v30 = vadd.f32 %v240_v24, %v1121_v4  ;;  %v272_v33 = vsel %vm266_vm2, %v259_v23, %v260_v25  ;;  %v239_v34 = vsel %vm233_vm0, %v226_v21, %v227_v26 }
  0x53   : > { %351 = vrot.lane.b32.xlu1 %v1129_v7, %s968_s15  ;;  %361 = vrot.lane.b32.xlu0 %v1131_v8, %s968_s15  ;;  %v250_v32 = vadd.f32 %v242_v27, %v1123_v5  ;;  %v273_v36 = vsel %vm266_vm2, %v258_v28, %v259_v23  ;;  %v238_v37 = vsel %vm233_vm0, %v227_v26, %v228_v29  ;;  %v262_v38 = vrot.slane %v1137_v11, 1  ;;  %p872_p4 = pnand %p871_p2, %p865_p1 }
  0x54   : > { %v230_v39 = vrot.slane %v1147_v17, 7  ;;  %v1200_v40 = vadd.f32 %v272_v33, %v251_v30  ;;  %v252_v41 = vadd.f32 %v239_v34, %v1129_v7  ;;  %v271_v42 = vsel %vm266_vm2, %v260_v25, %v261_v31 }
  0x55   : > { %v1209_v43 = vadd.f32 %v273_v36, %v250_v32  ;;  %v253_v44 = vadd.f32 %v238_v37, %v1139_v12  ;;  %v237_v45 = vsel %vm233_vm0, %v228_v29, %v229_v35  ;;  %v263_v46 = vrot.slane %v1147_v17, 1 }
  0x56   : > { %v270_v47 = vsel %vm266_vm2, %v261_v31, %v262_v38  ;;  %v236_v48 = vsel %vm233_vm0, %v229_v35, %v230_v39  ;;  %v264_v49 = vrot.slane %v1145_v16, 1  ;;  %v231_v50 = vrot.slane %v1145_v16, 7 }
  0x57   : > { %355 = vrot.lane.b32.xlu1 %v1137_v11, %s968_s15  ;;  %353 = vrot.lane.b32.xlu0 %v1139_v12, %s968_s15  ;;  %v265_v51 = vrot.slane %v1131_v8, 1  ;;  %v1225_v53 = vadd.f32 %v271_v42, %v252_v41  ;;  %v254_v54 = vadd.f32 %v237_v45, %v1137_v11  ;;  %v1232_v55 = vadd.f32 %v270_v47, %v253_v44 }
  0x58   : > { %v269_v56 = vsel %vm266_vm2, %v262_v38, %v263_v46  ;;  %v255_v57 = vadd.f32 %v236_v48, %v1147_v17  ;;  %v268_v58 = vsel %vm266_vm2, %v263_v46, %v264_v49  ;;  %v235_v59 = vsel %vm233_vm0, %v230_v39, %v231_v50 }
  0x59   : > { %v234_v60 = vsel %vm233_vm0, %v231_v50, %v232_v20  ;;  %v274_v61 = vsel %vm266_vm2, %v265_v51, %v258_v28  ;;  %v1246_v62 = vadd.f32 %v269_v56, %v254_v54  ;;  %v256_v0 = vadd.f32 %v235_v59, %v1145_v16 }
  0x5a   : > { %v1252_v63 = vadd.f32 %v268_v58, %v255_v57  ;;  %v257_v1 = vadd.f32 %v234_v60, %v1131_v8  ;;  %v267_v2 = vsel %vm266_vm2, %v264_v49, %v265_v51  ;;  %v282_v3 = vsel %vm224_vm3, %v1131_v8, %v274_v61 }
  0x5b   : > { %359 = vrot.lane.b32.xlu1 %v1145_v16, %s968_s15  ;;  %357 = vrot.lane.b32.xlu0 %v1147_v17, %s968_s15  ;;  %v1265_v6 = vadd.f32 %v267_v2, %v256_v0  ;;  %v1290_v30 = vand.u32 127, %v196_v15 }
  0x5c   : > { %v1267_v9 = vadd.f32 %v282_v3, %v257_v1 }
  0x5d   : > { %vm207_vm4 = vcmp.eq.s32.totalorder %v1290_v30, 0  ;;  %vm208_vm5 = vcmp.eq.s32.totalorder %v1290_v30, 127 }
  0x5f   : > { %393 = vrot.lane.b32.xlu1 %v1131_v8, %s969_s5  ;;  %379 = vrot.lane.b32.xlu0 %v1123_v5, %s969_s5 }
  0x63   : > { %383 = vrot.lane.b32.xlu1 %v1129_v7, %s969_s5  ;;  %381 = vrot.lane.b32.xlu0 %v1121_v4, %s969_s5 }
  0x67   : > { %387 = vrot.lane.b32.xlu1 %v1137_v11, %s969_s5  ;;  %385 = vrot.lane.b32.xlu0 %v1139_v12, %s969_s5 }
  0x6b   : > { %391 = vrot.lane.b32.xlu1 %v1145_v16, %s969_s5  ;;  %389 = vrot.lane.b32.xlu0 %v1147_v17, %s969_s5 }
  0x6f   : > { %291 = vrot.lane.b32.xlu0 %v1209_v43, %s968_s15  ;;  %293 = vrot.lane.b32.xlu1 %v1200_v40, %s968_s15 }
  0x73   : > { %295 = vrot.lane.b32.xlu0 %v1225_v53, %s968_s15  ;;  %297 = vrot.lane.b32.xlu1 %v1232_v55, %s968_s15 }
  0x77   : > { %299 = vrot.lane.b32.xlu0 %v1246_v62, %s968_s15  ;;  %301 = vrot.lane.b32.xlu1 %v1252_v63, %s968_s15 }
  0x7b   : > { %303 = vrot.lane.b32.xlu0 %v1265_v6, %s968_s15  ;;  %305 = vrot.lane.b32.xlu1 %v1267_v9, %s968_s15 }
  0x7f   : > { %315 = vrot.lane.b32.xlu0 %v1209_v43, %s969_s5  ;;  %317 = vrot.lane.b32.xlu1 %v1200_v40, %s969_s5 }
  0x83   : > { %319 = vrot.lane.b32.xlu0 %v1225_v53, %s969_s5  ;;  %321 = vrot.lane.b32.xlu1 %v1232_v55, %s969_s5 }
  0x87   : > { %323 = vrot.lane.b32.xlu0 %v1246_v62, %s969_s5  ;;  %325 = vrot.lane.b32.xlu1 %v1252_v63, %s969_s5 }
  0x8b   : > { %327 = vrot.lane.b32.xlu0 %v1265_v6, %s969_s5  ;;  %329 = vrot.lane.b32.xlu1 %v1267_v9, %s969_s5 }
  0xc1   : > { %v350_v10 = vpop.permute.xlu1 %349  ;;  %v348_v13 = vpop.permute.xlu0 %347 }
  0xc2   : > { %v364_v33 = vsel %vm207_vm4, %v1121_v4, %v350_v10  ;;  %v363_v35 = vsel %vm207_vm4, %v1123_v5, %v348_v13 }
  0xc3   : > { %v372_v39 = vadd.f32 %v364_v33, %v1121_v4  ;;  %v371_v45 = vadd.f32 %v363_v35, %v1123_v5 }
  0xc5   : > { %v352_v14 = vpop.permute.xlu1 %351  ;;  %v362_v19 = vpop.permute.xlu0 %361 }
  0xc6   : > { %v365_v34 = vsel %vm207_vm4, %v1129_v7, %v352_v14  ;;  %v370_v51 = vsel %vm207_vm4, %v1131_v8, %v362_v19 }
  0xc7   : > { %v373_v41 = vadd.f32 %v365_v34, %v1129_v7  ;;  %v378_v2 = vadd.f32 %v370_v51, %v1131_v8 }
  0xc9   : > { %v356_v20 = vpop.permute.xlu1 %355  ;;  %v354_v21 = vpop.permute.xlu0 %353 }
  0xca   : > { %v366_v42 = vsel %vm207_vm4, %v1139_v12, %v354_v21  ;;  %v367_v57 = vsel %vm207_vm4, %v1137_v11, %v356_v20 }
  0xcb   : > { %v374_v54 = vadd.f32 %v366_v42, %v1139_v12  ;;  %v375_v14 = vadd.f32 %v367_v57, %v1137_v11 }
  0xcd   : > { %v360_v22 = vpop.permute.xlu1 %359  ;;  %v358_v23 = vpop.permute.xlu0 %357 }
  0xce   : > { %v368_v58 = vsel %vm207_vm4, %v1147_v17, %v358_v23  ;;  %v369_v21 = vsel %vm207_vm4, %v1145_v16, %v360_v22 }
  0xcf   : > { %v376_v23 = vadd.f32 %v368_v58, %v1147_v17  ;;  %v377_v34 = vadd.f32 %v369_v21, %v1145_v16 }
  0xd1   : > { %v394_v24 = vpop.permute.xlu1 %393  ;;  %v380_v25 = vpop.permute.xlu0 %379 }
  0xd2   : > { %v395_v44 = vsel %vm208_vm5, %v1123_v5, %v380_v25  ;;  %v402_v59 = vsel %vm208_vm5, %v1131_v8, %v394_v24 }
  0xd3   : > { %v1331_v56 = vadd.f32 %v395_v44, %v371_v45  ;;  %v1360_v24 = vadd.f32 %v402_v59, %v378_v2 }
  0xd5   : > { %v384_v26 = vpop.permute.xlu1 %383  ;;  %v382_v27 = vpop.permute.xlu0 %381  ;;  %v411_v19 = vrot.slane %v1331_v56, 7  ;;  %v435_v57 = vrot.slane %v1331_v56, 1 }
  0xd6   : > { %v397_v15 = vsel %vm208_vm5, %v1129_v7, %v384_v26  ;;  %v396_v36 = vsel %vm208_vm5, %v1121_v4, %v382_v27 }
  0xd7   : > { %v1320_v46 = vadd.f32 %v397_v15, %v373_v41  ;;  %v1322_v47 = vadd.f32 %v396_v36, %v372_v39  ;;  %v418_v15 = vrot.slane %v1360_v24, 7 }
  0xd9   : > { %v388_v28 = vpop.permute.xlu1 %387  ;;  %v386_v29 = vpop.permute.xlu0 %385  ;;  %v437_v60 = vrot.slane %v1320_v46, 1  ;;  %v412_v61 = vrot.slane %v1322_v47, 7  ;;  %v436_v0 = vrot.slane %v1322_v47, 1  ;;  %v413_v35 = vrot.slane %v1320_v46, 7 }
  0xda   : > { %v398_v48 = vsel %vm208_vm5, %v1139_v12, %v386_v29  ;;  %v399_v3 = vsel %vm208_vm5, %v1137_v11, %v388_v28 }
  0xdb   : > { %v406_v1 = vadd.f32 %v398_v48, %v374_v54  ;;  %v407_v25 = vadd.f32 %v399_v3, %v375_v14  ;;  %v425_v27 = vsel %vm233_vm0, %v411_v19, %v412_v61  ;;  %v448_v28 = vsel %vm266_vm2, %v436_v0, %v437_v60 }
  0xdc   : > { %v460_v36 = vsub.f32 %v425_v27, %v448_v28  ;;  %v424_v59 = vsel %vm233_vm0, %v412_v61, %v413_v35  ;;  %v426_v3 = vsel %vm233_vm0, %v418_v15, %v411_v19 }
  0xdd   : > { %v392_v31 = vpop.permute.xlu1 %391  ;;  %v390_v32 = vpop.permute.xlu0 %389  ;;  %v438_v26 = vrot.slane %v406_v1, 1  ;;  %v415_v39 = vrot.slane %v407_v25, 7  ;;  %v414_v41 = vrot.slane %v406_v1, 7  ;;  %v439_v45 = vrot.slane %v407_v25, 1 }
  0xde   : > { %v400_v20 = vsel %vm208_vm5, %v1147_v17, %v390_v32  ;;  %v401_v29 = vsel %vm208_vm5, %v1145_v16, %v392_v31  ;;  %v442_v31 = vrot.slane %v1360_v24, 1  ;;  %v476_v1 = vmul.f32 %v460_v36, %v460_v36 }
  0xdf   : > { %v408_v32 = vadd.f32 %v400_v20, %v376_v23  ;;  %v1378_v42 = vadd.f32 %v401_v29, %v377_v34  ;;  %v447_v44 = vsel %vm266_vm2, %v437_v60, %v438_v26  ;;  %v422_v21 = vsel %vm233_vm0, %v414_v41, %v415_v39 }
  0xe0   : > { %v461_v2 = vsub.f32 %v424_v59, %v447_v44  ;;  %v423_v27 = vsel %vm233_vm0, %v413_v35, %v414_v41  ;;  %v446_v19 = vsel %vm266_vm2, %v438_v26, %v439_v45 }
  0xe1   : > { %v1309_v37 = vpop.permute.xlu0 %291  ;;  %v294_v38 = vpop.permute.xlu1 %293  ;;  %v440_v48 = vrot.slane %v408_v32, 1  ;;  %v417_v14 = vrot.slane %v1378_v42, 7  ;;  %v441_v20 = vrot.slane %v1378_v42, 1  ;;  %v462_v44 = vsub.f32 %v423_v27, %v446_v19 }
  0xe2   : > { %v308_v46 = vsel %vm207_vm4, %v1200_v40, %v294_v38  ;;  %v416_v38 = vrot.slane %v408_v32, 7  ;;  %v477_v26 = vmul.f32 %v461_v2, %v461_v2 }
  0xe3   : > { %v445_v61 = vsel %vm266_vm2, %v439_v45, %v440_v48  ;;  %v444_v59 = vsel %vm266_vm2, %v440_v48, %v441_v20 }
  0xe5   : > { %v296_v49 = vpop.permute.xlu0 %295  ;;  %v298_v50 = vpop.permute.xlu1 %297 }
  0xe6   : > { %v309_v28 = vsel %vm207_vm4, %v1225_v53, %v296_v49  ;;  %v310_v29 = vsel %vm207_vm4, %v1232_v55, %v298_v50  ;;  %v420_v49 = vsel %vm233_vm0, %v416_v38, %v417_v14  ;;  %v421_v50 = vsel %vm233_vm0, %v415_v39, %v416_v38 }
  0xe9   : > { %v300_v10 = vpop.permute.xlu0 %299  ;;  %v1349_v13 = vpop.permute.xlu1 %301 }
  0xed   : > { %v1371_v22 = vpop.permute.xlu0 %303  ;;  %v1373_v33 = vpop.permute.xlu1 %305 }
  0xf1   : > { %v316_v51 = vpop.permute.xlu0 %315  ;;  %v318_v54 = vpop.permute.xlu1 %317 }
  0xf2   : > { %v332_v58 = vsel %vm208_vm5, %v1200_v40, %v318_v54  ;;  %v331_v39 = vsel %vm208_vm5, %v1209_v43, %v316_v51 }
  0xf3   : > { %v340_v60 = vsub.f32 %v308_v46, %v332_v58  ;;  %v463_v58 = vsub.f32 %v422_v21, %v445_v61  ;;  %v478_v21 = vmul.f32 %v462_v44, %v462_v44  ;;  %v464_v61 = vsub.f32 %v421_v50, %v444_v59 }
  0xf5   : > { %v468_v40 = vmul.f32 %v340_v60, %v340_v60  ;;  %v320_v23 = vpop.permute.xlu0 %319  ;;  %v322_v25 = vpop.permute.xlu1 %321  ;;  %v312_v60 = vsel %vm207_vm4, %v1252_v63, %v1349_v13  ;;  %v307_v13 = vsel %vm207_vm4, %v1209_v43, %v1309_v37  ;;  %v313_v43 = vsel %vm207_vm4, %v1265_v6, %v1371_v22 }
  0xf6   : > { %v333_v32 = vsel %vm208_vm5, %v1225_v53, %v320_v23  ;;  %v334_v34 = vsel %vm208_vm5, %v1232_v55, %v322_v25  ;;  %v443_v53 = vsel %vm266_vm2, %v441_v20, %v442_v31  ;;  %v311_v55 = vsel %vm207_vm4, %v1246_v62, %v300_v10 }
  0xf7   : > { %v341_v35 = vsub.f32 %v309_v28, %v333_v32  ;;  %v342_v36 = vsub.f32 %v310_v29, %v334_v34  ;;  %v1418_v41 = vadd.f32 %v476_v1, %v468_v40  ;;  %v479_v23 = vmul.f32 %v463_v58, %v463_v58 }
  0xf8   : > { %v465_v25 = vsub.f32 %v420_v49, %v443_v53  ;;  %v339_v37 = vsub.f32 %v307_v13, %v331_v39 }
  0xf9   : > { %v469_v45 = vmul.f32 %v341_v35, %v341_v35  ;;  %v324_v54 = vpop.permute.xlu0 %323  ;;  %493 = vmin.xlane.f32.xlu1 %v1418_v41  ;;  %v326_v46 = vpop.permute.xlu1 %325  ;;  %v470_v2 = vmul.f32 %v342_v36, %v342_v36  ;;  %v480_v35 = vmul.f32 %v464_v61, %v464_v61  ;;  %v314_v36 = vsel %vm207_vm4, %v1267_v9, %v1373_v33 }
  0xfa   : > { %v335_v10 = vsel %vm208_vm5, %v1246_v62, %v324_v54  ;;  %v336_v1 = vsel %vm208_vm5, %v1252_v63, %v326_v46  ;;  %v449_v62 = vsel %vm266_vm2, %v435_v57, %v436_v0  ;;  %v427_v0 = vsel %vm209_vm1, %v1331_v56, %v426_v3 }
  0xfb   : > { %v343_v38 = vsub.f32 %v311_v55, %v335_v10  ;;  %v344_v48 = vsub.f32 %v312_v60, %v336_v1  ;;  %v1449_v20 = vadd.f32 %v477_v26, %v469_v45  ;;  %v486_v29 = vadd.f32 %v478_v21, %v470_v2 }
  0xfc   : > { %v459_v34 = vsub.f32 %v427_v0, %v449_v62  ;;  %v481_v3 = vmul.f32 %v465_v25, %v465_v25  ;;  %v419_v56 = vsel %vm233_vm0, %v417_v14, %v418_v15  ;;  %v467_v26 = vmul.f32 %v339_v37, %v339_v37 }
  0xfd   : > { %v471_v51 = vmul.f32 %v343_v38, %v343_v38  ;;  %495 = vmin.xlane.f32.xlu0 %v1449_v20  ;;  %v328_v63 = vpop.permute.xlu0 %327  ;;  %v330_v40 = vpop.permute.xlu1 %329  ;;  %v472_v27 = vmul.f32 %v344_v48, %v344_v48 }
  0xfe   : > { %v337_v47 = vsel %vm208_vm5, %v1265_v6, %v328_v63  ;;  %v338_v32 = vsel %vm208_vm5, %v1267_v9, %v330_v40  ;;  %v450_v6 = vsel %vm266_vm2, %v442_v31, %v435_v57  ;;  %v475_v53 = vmul.f32 %v459_v34, %v459_v34 }
  0xff   : > { %v345_v19 = vsub.f32 %v313_v43, %v337_v47  ;;  %v487_v28 = vadd.f32 %v479_v23, %v471_v51  ;;  %v346_v44 = vsub.f32 %v314_v36, %v338_v32  ;;  %v488_v57 = vadd.f32 %v480_v35, %v472_v27 }
 0x100   : > { %v458_v49 = vsel %vm224_vm3, %v1360_v24, %v450_v6  ;;  %v483_v33 = vadd.f32 %v475_v53, %v467_v26 }
 0x101   : > { %v473_v22 = vmul.f32 %v345_v19, %v345_v19  ;;  %499 = vmin.xlane.f32.xlu1 %v487_v28  ;;  %497 = vmin.xlane.f32.xlu0 %v486_v29  ;;  %v466_v30 = vsub.f32 %v419_v56, %v458_v49  ;;  %v474_v9 = vmul.f32 %v346_v44, %v346_v44 }
 0x103   : > { %v489_v31 = vadd.f32 %v481_v3, %v473_v22  ;;  %v482_v50 = vmul.f32 %v466_v30, %v466_v30 }
 0x105   : > { %503 = vmin.xlane.f32.xlu1 %v489_v31  ;;  %501 = vmin.xlane.f32.xlu0 %v488_v57  ;;  %v490_v42 = vadd.f32 %v482_v50, %v474_v9 }
 0x109   : > { %491 = vmin.xlane.f32.xlu0 %v483_v33 }
 0x10d   : > { %505 = vmin.xlane.f32.xlu0 %v490_v42 }
 0x186   : > { %v494_v15 = vpop.xlane.xlu1 %493 }
 0x18a   : > { %v496_v18 = vpop.xlane.xlu0 %495 }
 0x18e   : > { %v498_v14 = vpop.xlane.xlu0 %497  ;;  %v500_v55 = vpop.xlane.xlu1 %499 }
 0x192   : > { %v502_v45 = vpop.xlane.xlu0 %501  ;;  %v504_v46 = vpop.xlane.xlu1 %503 }
 0x193   : > { %v508_v24 = vmin.f32 %v494_v15, %v502_v45  ;;  %v509_v59 = vmin.f32 %v496_v18, %v504_v46 }
 0x196   : > { %v492_v54 = vpop.xlane.xlu0 %491 }
 0x197   : > { %v507_v58 = vmin.f32 %v492_v54, %v500_v55 }
 0x199   : > { %v511_v39 = vmin.f32 %v507_v58, %v508_v24 }
 0x19a   : > { %v506_v52 = vpop.xlane.xlu0 %505 }
 0x19b   : > { %v510_v60 = vmin.f32 %v498_v14, %v506_v52 }
 0x19d   : > { %v512_v10 = vmin.f32 %v509_v59, %v510_v60 }
 0x19f   : > { %v513_v1 = vmin.f32 %v511_v39, %v512_v10 }
 0x1a1   : > { %v514_v2 = vrot.slane %v513_v1, 4 }
 0x1a3   : > { %v515_v38 = vmin.f32 %v513_v1, %v514_v2 }
 0x1a5   : > { %v516_v48 = vrot.slane %v515_v38, 2 }
 0x1a7   : > { %v517_v13 = vmin.f32 %v515_v38, %v516_v48 }
 0x1a9   : > { %v518_v21 = vrot.slane %v517_v13, 1 }
 0x1ab   : > { %v519_v62 = vmin.f32 %v517_v13, %v518_v21 }
 0x1ad   : > { %v520_v51 = vand.u32 2147483647, %v519_v62 }
 0x1af   : > { %v522_v63 = vadd.f32 %v520_v51, %v1418_v41  ;;  %v521_v40 = vadd.f32 %v520_v51, %v483_v33  ;;  %v524_v23 = vadd.f32 %v520_v51, %v486_v29  ;;  %v523_v25 = vadd.f32 %v520_v51, %v1449_v20 }
 0x1b0   : > { %v526_v61 = vadd.f32 %v520_v51, %v488_v57  ;;  %v525_v43 = vadd.f32 %v520_v51, %v487_v28  ;;  %v528_v37 = vadd.f32 %v520_v51, %v490_v42  ;;  %v527_v47 = vadd.f32 %v520_v51, %v489_v31 }
 0x1b1   : > { %531 = vmax.xlane.f32.xlu0 %v522_v63  ;;  %529 = vmax.xlane.f32.xlu1 %v521_v40 }
 0x1b5   : > { %535 = vmax.xlane.f32.xlu0 %v524_v23  ;;  %533 = vmax.xlane.f32.xlu1 %v523_v25 }
 0x1b9   : > { %539 = vmax.xlane.f32.xlu0 %v526_v61  ;;  %537 = vmax.xlane.f32.xlu1 %v525_v43 }
 0x1bd   : > { %543 = vmax.xlane.f32.xlu0 %v528_v37  ;;  %541 = vmax.xlane.f32.xlu1 %v527_v47 }
 0x23e   : > { %v532_v0 = vpop.xlane.xlu0 %531  ;;  %v530_v27 = vpop.xlane.xlu1 %529 }
 0x242   : > { %v536_v19 = vpop.xlane.xlu0 %535  ;;  %v534_v41 = vpop.xlane.xlu1 %533 }
 0x246   : > { %v540_v32 = vpop.xlane.xlu0 %539  ;;  %v538_v34 = vpop.xlane.xlu1 %537 }
 0x247   : > { %v546_v6 = vmax.f32 %v532_v0, %v540_v32  ;;  %v545_v29 = vmax.f32 %v530_v27, %v538_v34 }
 0x249   : > { %v549_v35 = vmax.f32 %v545_v29, %v546_v6 }
 0x24a   : > { %v544_v20 = vpop.xlane.xlu0 %543  ;;  %v542_v22 = vpop.xlane.xlu1 %541 }
 0x24b   : > { %v548_v3 = vmax.f32 %v536_v19, %v544_v20  ;;  %v547_v28 = vmax.f32 %v534_v41, %v542_v22 }
 0x24d   : > { %v550_v36 = vmax.f32 %v547_v28, %v548_v3 }
 0x24f   : > { %v551_v56 = vmax.f32 %v549_v35, %v550_v36 }
 0x251   : > { %v552_v26 = vrot.slane %v551_v56, 4 }
 0x253   : > { %v553_v44 = vmax.f32 %v551_v56, %v552_v26 }
 0x255   : > { %v554_v31 = vrot.slane %v553_v44, 2 }
 0x257   : > { %v555_v57 = vmax.f32 %v553_v44, %v554_v31 }
 0x259   : > { %v556_v49 = vrot.slane %v555_v57, 1 }
 0x25b   : > { %v557_v53 = vmax.f32 %v555_v57, %v556_v49 }
 0x25d   : > { %v558_v30 = vmax.f32 %v557_v53, 1e-30 }
 0x25f   : > { %820 = vrcp.f32 %v558_v30 }
 0x269   : > { %v821_v9 = vpop.eup %820 }
 0x26a   : > { %v561_v33 = vmul.f32 %v821_v9, %v521_v40  ;;  %v562_v50 = vmul.f32 %v821_v9, %v522_v63  ;;  %v563_v42 = vmul.f32 %v821_v9, %v523_v25  ;;  %v564_v18 = vmul.f32 %v821_v9, %v524_v23 }
 0x26b   : > { %v565_v15 = vmul.f32 %v821_v9, %v525_v43  ;;  %v566_v14 = vmul.f32 %v821_v9, %v526_v61  ;;  %v567_v55 = vmul.f32 %v821_v9, %v527_v47  ;;  %v568_v45 = vmul.f32 %v821_v9, %v528_v37 }
 0x26c   : > { %v577_v54 = vsub.f32 %v1123_v5, %v561_v33  ;;  %v578_v46 = vsub.f32 %v1121_v4, %v562_v50  ;;  %v579_v58 = vsub.f32 %v1129_v7, %v563_v42  ;;  %v580_v52 = vsub.f32 %v1139_v12, %v564_v18  ;;  %569 = vst [vmem:[%s177_s17] sm:$0xff] %v561_v33 }
 0x26d   : > { %570 = vst [vmem:[%s177_s17 + $0x8] sm:$0xff] %v562_v50  ;;  %571 = vst [vmem:[%s177_s17 + $0x10] sm:$0xff] %v563_v42  ;;  %v581_v5 = vsub.f32 %v1137_v11, %v565_v15  ;;  %v582_v4 = vsub.f32 %v1147_v17, %v566_v14  ;;  %v583_v7 = vsub.f32 %v1145_v16, %v567_v55 }
 0x26e   : > { %572 = vst [vmem:[%s177_s17 + $0x18] sm:$0xff] %v564_v18  ;;  %v584_v12 = vsub.f32 %v1131_v8, %v568_v45  ;;  %573 = vst [vmem:[%s177_s17 + $0x20] sm:$0xff] %v565_v15  ;;  %v585_v24 = vmax.f32 %v577_v54, 0.0  ;;  %v586_v59 = vmax.f32 %v578_v46, 0.0  ;;  %v587_v60 = vmax.f32 %v579_v58, 0.0 }
 0x26f   : > { %574 = vst [vmem:[%s177_s17 + $0x28] sm:$0xff] %v566_v14  ;;  %575 = vst [vmem:[%s177_s17 + $0x30] sm:$0xff] %v567_v55  ;;  %v588_v39 = vmax.f32 %v580_v52, 0.0 }
 0x270   : > { %576 = vst [vmem:[%s177_s17 + $0x38] sm:$0xff] %v568_v45 }
 0x271   : > { %875 = shalt.err (!%p872_p4)
}
 0x272   : > { %s876_s18 = scalar_lea.hbm %s1503_s28, 1024  ;;  %s880_s15 = scalar_lea.hbm %s1612_s3, 5120 }
 0x273   : > { %p877_p6 = scmp.ne.s32.totalorder %s1503_s28, %s876_s18  ;;  %p881_p3 = scmp.lt.u32.totalorder %s1503_s28, %s1612_s3 }
 0x274   : > { %p882_p5 = scmp.lt.u32.totalorder %s880_s15, %s876_s18  ;;  %p884_p9 = scmp.lt.u32.totalorder %s876_s18, %s1503_s28 }
 0x275   : > { %p878_p7 = pnand %p877_p6, %p1619_p13 }
 0x276   : > { %p883_p10 = por %p882_p5, %p881_p3 }
 0x277   : > { %p879_p8 = pneg %p878_p7 }
 0x278   : > { %p885_p0 = por %p884_p9, %p883_p10 }
 0x27a   : > { %p886_p1 = pnand %p885_p0, %p879_p8 }
 0x27c   : > { %889 = shalt.err (!%p886_p1)
}
 0x27d   : > { %s971_s21 = smov 128   ;;  %s972_s26 = smov 8   ;;  %v589_v8 = vmax.f32 %v581_v5, 0.0  ;;  %v590_v11 = vmax.f32 %v582_v4, 0.0  ;;  %v591_v16 = vmax.f32 %v583_v7, 0.0  ;;  %v592_v17 = vmax.f32 %v584_v12, 0.0  ;;  %593 = vst [vmem:[%s1512_s29] sm:$0xff] %v585_v24 }
 0x27e   : > { %765 = dma.vmem_to_hbm [thread:$0]  (%p1619_p13), %s1505_s20, 1024, %s1503_s28, %s607_s8, %s971_s21, %s971_s21, %s972_s26  }
 0x27f   : > { %s1551_s11 = scalar_lea.hbm %s1611_s2, %s760_s16  ;;  %594 = vst [vmem:[%s1512_s29 + $0x8] sm:$0xff] %v586_v59  ;;  %595 = vst [vmem:[%s1512_s29 + $0x10] sm:$0xff] %v587_v60  ;;  %s602_s0 = scalar_lea.sflag [#allocation6], %s1109_s12 }
 0x280   : > { %596 = vst [vmem:[%s1512_s29 + $0x18] sm:$0xff] %v588_v39  ;;  %597 = vst [vmem:[%s1512_s29 + $0x20] sm:$0xff] %v589_v8  ;;  %s890_s20 = scalar_lea.vmem %s1555_s4, 1024  ;;  %s973_s16 = smov [#allocation7]  }
 0x281   : > { %598 = vst [vmem:[%s1512_s29 + $0x28] sm:$0xff] %v590_v11  ;;  %599 = vst [vmem:[%s1512_s29 + $0x30] sm:$0xff] %v591_v16  ;;  %p891_p11 = scmp.ne.s32.totalorder %s1555_s4, %s890_s20  ;;  %s894_s28 = sshll.u32 %s973_s16, 4  ;;  %s895_s28 = int_to_ptr.vmem [resolvable:$false] %s894_s28 }
 0x282   : > { %600 = vst [vmem:[%s1512_s29 + $0x38] sm:$0xff] %v592_v17  ;;  %s896_s8 = scalar_lea.vmem %s895_s28, 2048  ;;  %p897_p4 = scmp.lt.s32.totalorder %s1555_s4, %s895_s28 }
 0x283   : > { %p892_p12 = pnand %p891_p11, %p1619_p13  ;;  %p898_p6 = scmp.lt.s32.totalorder %s896_s8, %s890_s20 }
 0x285   : > { %p893_p2 = pneg %p892_p12  ;;  %p899_p7 = por %p898_p6, %p897_p4 }
 0x287   : > { %p900_p8 = pnand %p899_p7, %p893_p2 }
 0x289   : > { %903 = shalt.err (!%p900_p8)
}
 0x28a   : > { %s904_s29 = scalar_lea.hbm %s1551_s11, 1024  ;;  %s908_s19 = scalar_lea.hbm %s1611_s2, 5120 }
 0x28b   : > { %p905_p3 = scmp.ne.s32.totalorder %s1551_s11, %s904_s29  ;;  %p909_p9 = scmp.lt.u32.totalorder %s1551_s11, %s1611_s2 }
 0x28c   : > { %p910_p0 = scmp.lt.u32.totalorder %s908_s19, %s904_s29  ;;  %p912_p11 = scmp.lt.u32.totalorder %s904_s29, %s1551_s11 }
 0x28d   : > { %p906_p5 = pnand %p905_p3, %p1619_p13 }
 0x28e   : > { %p911_p1 = por %p910_p0, %p909_p9 }
 0x28f   : > { %p907_p10 = pneg %p906_p5 }
 0x290   : > { %p913_p12 = por %p912_p11, %p911_p1 }
 0x292   : > { %p914_p2 = pnand %p913_p12, %p907_p10 }
 0x294   : > { %917 = shalt.err (!%p914_p2)
}
 0x295   : > { %764 = dma.vmem_to_hbm [thread:$0]  (%p1619_p13), %s1555_s4, 1024, %s1551_s11, %s602_s0, %s971_s21, %s971_s21, %s972_s26  }
 0x296 PF: > { %p780_p4 = scmp.ge.s32.totalorder %s962_s25, 2  ;;  %s651_s5 = sand.u32 1, %s950_s22  }
 0x297   : > { %p1620_p6 = scmp.ne.s32.totalorder %s1617_s7, 0  ;;  %s652_s17 = scalar_lea.sflag [#allocation6], %s651_s5 }
 0x299   : > { %p773_p7 = pnand %p780_p4, %p1620_p6 }
 0x29b   : > { %941 = dma.done.wait (!%p773_p7), %s652_s17, 1024  }
 0x29c   : > { %943 = vsyncadd (!%p773_p7), %s652_s17, 4294966272  ;;  %s661_s6 = scalar_lea.sflag [#allocation9], %s651_s5 }
 0x29d   : > { %945 = dma.done.wait (!%p773_p7), %s661_s6, 1024  }
 0x29e   : > { %947 = vsyncadd (!%p773_p7), %s661_s6, 4294966272  ;;  %p24_p13 = scmp.ge.s32.totalorder %s1031_s27, 7   ;;  %s1621_s22 = smov %s954_s23 }
 0x29f   : > { %s1622_s23 = smov %s958_s24  ;;  %s1623_s24 = smov %s1043_s30 }
 0x2a0   : > { %s1624_s25 = smov %s1031_s27  ;;  %26 = sbr.rel (!%p24_p13) target bundleno = 19 (0x13), region = 86 }
 0x2a7   :  { %666 = vsyncpa [#allocation5], 1 }
 0x2a8   :  { %668 = vsyncpa [#allocation5 + $0x1], 1 }
 0x2a9   :  { %669 = vsyncpa [#allocation6], 1 }
 0x2aa   :  { %671 = vsyncpa [#allocation6 + $0x1], 1 }
 0x2ab   :  { %672 = vsyncpa [#allocation9], 1 }
 0x2ac   :  { %674 = vsyncpa [#allocation9 + $0x1], 1 }

</bundles_post_ra>
